<compile_context>
chip_gen: v7x
topology: tpu7x:2x2x1
jax: 0.10.0
libtpu: 0.0.40
codegen_flags: <defaults>
</compile_context>

<pallas_src>
import math
from functools import partial

import jax
import jax.numpy as jnp
from jax.experimental import pallas as pl
from jax.experimental.pallas import tpu as pltpu

# Scoped-VMEM ceiling: safe on v7x (64 MiB physical per TC, leaves headroom
# for compiler-internal scratch); v5e/v6e have 128 MiB so it is conservative.
_VMEM_LIMIT = 40 * 1024 * 1024


def _sublane_step(dtype):
    """Second-minor tiling granule for a dtype: 8 (f32), 16 (bf16), 32 (i8)."""
    return max(8, 32 // jnp.dtype(dtype).itemsize)


def _pick_tile(dim, target, step):
    """Largest tile <= target (multiple of `step`) that evenly divides `dim`;
    falls back to the full dimension (always a legal TPU block size)."""
    if dim <= target:
        return dim
    target = max(step, (target // step) * step)
    for t in range(target, 0, -step):
        if dim % t == 0:
            return t
    return dim


# --------------------------- tiled linear kernel ----------------------------

def _linear_kernel(x_ref, w_ref, b_ref, o_ref, acc_ref):
    k = pl.program_id(2)

    @pl.when(k == 0)
    def _init():
        acc_ref[...] = jnp.zeros_like(acc_ref)

    acc_ref[...] += jnp.dot(x_ref[...], w_ref[...],
                            preferred_element_type=jnp.float32)

    @pl.when(k == pl.num_programs(2) - 1)
    def _finalize():
        # Bias added once at finalize: the inner K loop stays pure MXU work.
        o_ref[...] = (acc_ref[...] + b_ref[...].astype(jnp.float32)
                      ).astype(o_ref.dtype)


def linear(x2d, w, b, *, out_dtype=None, tm=512, tn=512, tk=512):
    """x2d: (M, K) @ w: (K, N) + b: (N,) -> (M, N), tiled + pipelined."""
    M, K = x2d.shape
    K2, N = w.shape
    assert K == K2
    out_dtype = x2d.dtype if out_dtype is None else out_dtype
    sub_m = max(_sublane_step(x2d.dtype), _sublane_step(out_dtype))
    tm = _pick_tile(M, tm, sub_m)
    tn = _pick_tile(N, tn, 128)
    tk = _pick_tile(K, tk, 128)
    b2d = b.reshape(1, N)
    grid = (M // tm, N // tn, K // tk)
    bytes_accessed = (M * K * x2d.dtype.itemsize + K * N * w.dtype.itemsize
                      + N * b.dtype.itemsize
                      + M * N * jnp.dtype(out_dtype).itemsize)
    return pl.pallas_call(
        _linear_kernel,
        out_shape=jax.ShapeDtypeStruct((M, N), out_dtype),
        grid=grid,
        in_specs=[
            pl.BlockSpec((tm, tk), lambda i, j, k: (i, k)),
            pl.BlockSpec((tk, tn), lambda i, j, k: (k, j)),
            pl.BlockSpec((1, tn), lambda i, j, k: (0, j)),
        ],
        out_specs=pl.BlockSpec((tm, tn), lambda i, j, k: (i, j)),
        scratch_shapes=[pltpu.VMEM((tm, tn), jnp.float32)],
        compiler_params=pltpu.CompilerParams(
            dimension_semantics=("parallel", "parallel", "arbitrary"),
            vmem_limit_bytes=_VMEM_LIMIT,
        ),
        cost_estimate=pl.CostEstimate(
            flops=2 * M * N * K, transcendentals=0,
            bytes_accessed=bytes_accessed),
    )(x2d, w, b2d)


# ----------------------- flash-style attention kernel -----------------------

def _flash_attn_kernel(*refs, h, d_k, kv_fused):
    if kv_fused:
        q_ref, kv_ref, o_ref, m_sc, l_sc, acc_sc = refs
    else:
        q_ref, k_ref, v_ref, o_ref, m_sc, l_sc, acc_sc = refs

    ik = pl.program_id(2)
    D = h * d_k

    @pl.when(ik == 0)
    def _init():
        m_sc[...] = jnp.full_like(m_sc, -jnp.inf)
        l_sc[...] = jnp.zeros_like(l_sc)
        acc_sc[...] = jnp.zeros_like(acc_sc)

    # Operands stay in their native (e.g. bf16) dtype for the MXU; softmax
    # statistics and the accumulator are f32.  The 1/sqrt(d_k) scale is
    # pre-folded into the Q projection weights, so no scaling happens here.
    q = q_ref[0]                                     # (tq,  D)
    if kv_fused:
        kv = kv_ref[0]                               # (tkv, 2D) = [K | V]
        kk = kv[:, :D]                               # 128-aligned -> free
        vv = kv[:, D:]
    else:
        kk = k_ref[0]                                # (tkv, D)
        vv = v_ref[0]                                # (tkv, D)

    tq = q.shape[0]
    m_prev = m_sc[...]                               # (tq, h) f32
    l_prev = l_sc[...]                               # (tq, h) f32
    acc_prev = acc_sc[...]                           # (tq, D) f32

    # TODO(synk): attention mask (masked_fill before softmax) not wired in;
    # the forward path under test calls with mask=None.
    m_cols, l_cols, alpha_cols, pv_cols = [], [], [], []
    for hd in range(h):                              # static unroll over heads
        c0, c1 = hd * d_k, (hd + 1) * d_k
        qh, kh, vh = q[:, c0:c1], kk[:, c0:c1], vv[:, c0:c1]

        # scores = qh @ kh^T, f32 accumulation, no materialized transpose.
        s = jax.lax.dot_general(qh, kh, (((1,), (1,)), ((), ())),
                                preferred_element_type=jnp.float32)  # (tq,tkv)

        m_prev_h = m_prev[:, hd:hd + 1]
        m_new_h = jnp.maximum(m_prev_h, jnp.max(s, axis=-1, keepdims=True))
        alpha_h = jnp.exp(m_prev_h - m_new_h)                        # (tq, 1)
        p = jnp.exp(s - m_new_h)                                     # f32
        l_cols.append(alpha_h * l_prev[:, hd:hd + 1]
                      + jnp.sum(p, axis=-1, keepdims=True))
        pv_cols.append(jax.lax.dot_general(
            p.astype(vh.dtype), vh, (((1,), (0,)), ((), ())),
            preferred_element_type=jnp.float32))                     # (tq,d_k)
        m_cols.append(m_new_h)
        alpha_cols.append(jnp.broadcast_to(alpha_h, (tq, d_k)))

    # Exactly one lane-dense store per scratch per kv step: per-head results
    # are assembled in registers (no sub-128-lane masked RMWs on VMEM).
    m_sc[...] = jnp.concatenate(m_cols, axis=-1)                     # (tq, h)
    l_sc[...] = jnp.concatenate(l_cols, axis=-1)                     # (tq, h)
    alpha_full = jnp.concatenate(alpha_cols, axis=-1)                # (tq, D)
    pv_full = jnp.concatenate(pv_cols, axis=-1)                      # (tq, D)
    acc_sc[...] = alpha_full * acc_prev + pv_full

    @pl.when(ik == pl.num_programs(2) - 1)
    def _finalize():
        l_all = l_sc[...]                                            # (tq, h)
        l_full = jnp.concatenate(
            [jnp.broadcast_to(l_all[:, hd:hd + 1], (tq, d_k))
             for hd in range(h)], axis=-1)                           # (tq, D)
        # Exact division (not the approx reciprocal) -> parity with PyTorch.
        # Single unmasked (tq, D) lane-dense store.
        o_ref[0] = (acc_sc[...] / l_full).astype(o_ref.dtype)


def _mha_attention(q_arr, kv_args, *, h, d_k, out_dtype, q_colblk=0,
                   tq_target=512, tkv_target=512):
    """q_arr: (B, Sq, Cq) with the Q slab at D-wide column block `q_colblk`.
    kv_args is either (kv_arr,) with columns [K|V] (one 2D-wide KV DMA per kv
    step) or (k_arr, v_arr) for fully separate projections."""
    kv_fused = len(kv_args) == 1
    D = h * d_k
    B, Sq = q_arr.shape[0], q_arr.shape[1]
    Skv = kv_args[0].shape[1]

    sub_q = max(_sublane_step(q_arr.dtype), _sublane_step(out_dtype))
    tq = _pick_tile(Sq, tq_target, sub_q)
    # tkv is the lane dim of the (tq, tkv) score/p matrices -> keep it a
    # multiple of 128 when tiling (full dim fallback is always legal).
    tkv = _pick_tile(Skv, tkv_target, 128)

    # v7x has 2 TensorCores that shard the parallel grid axes; keep the
    # (B, Sq/tq) parallel extent >= 2 when possible.
    if B * (Sq // tq) < 2:
        tq_half = _pick_tile(Sq, tq // 2, sub_q)
        if tq_half < Sq:
            tq = tq_half

    grid = (B, Sq // tq, Skv // tkv)

    q_spec = pl.BlockSpec((1, tq, D), lambda b, iq, ik, c=q_colblk: (b, iq, c))
    if kv_fused:
        kv_specs = [pl.BlockSpec((1, tkv, 2 * D), lambda b, iq, ik: (b, ik, 0))]
    else:
        kv_specs = [pl.BlockSpec((1, tkv, D), lambda b, iq, ik: (b, ik, 0)),
                    pl.BlockSpec((1, tkv, D), lambda b, iq, ik: (b, ik, 0))]

    kv_item = jnp.dtype(kv_args[0].dtype).itemsize
    cost = pl.CostEstimate(
        flops=4 * B * Sq * Skv * D,                  # QK^T + PV
        transcendentals=B * Sq * Skv * h,            # exp per score element
        bytes_accessed=(B * Sq * D * jnp.dtype(q_arr.dtype).itemsize
                        + B * Skv * 2 * D * kv_item
                        + B * Sq * D * jnp.dtype(out_dtype).itemsize),
    )

    return pl.pallas_call(
        partial(_flash_attn_kernel, h=h, d_k=d_k, kv_fused=kv_fused),
        out_shape=jax.ShapeDtypeStruct((B, Sq, D), out_dtype),
        grid=grid,
        in_specs=[q_spec] + kv_specs,
        out_specs=pl.BlockSpec((1, tq, D), lambda b, iq, ik: (b, iq, 0)),
        scratch_shapes=[
            pltpu.VMEM((tq, h), jnp.float32),   # running row max (per head)
            pltpu.VMEM((tq, h), jnp.float32),   # running softmax denominator
            pltpu.VMEM((tq, D), jnp.float32),   # running output accumulator
        ],
        compiler_params=pltpu.CompilerParams(
            dimension_semantics=("parallel", "parallel", "arbitrary"),
            vmem_limit_bytes=_VMEM_LIMIT,
        ),
        cost_estimate=cost,
    )(q_arr, *kv_args)


# --------------------------- module-level wrapper ----------------------------

def init_multihead_params(key, h, d_model, dtype=jnp.float32):
    """Mimics nn.Linear init (uniform +-1/sqrt(fan_in)); weights stored
    (in, out) so kernels compute x @ W + b.  Also builds derived tensors:
      * wq_s / wq_b_s : Q projection with the 1/sqrt(d_k) scale folded in.
      * w_kv  (D, 2D) : [K | V] fused projection (key-is-value path).
      * w_qkv (D, 3D) : [K | V | Q*scale] fused projection (self-attention).
    """
    assert d_model % h == 0
    d_k = d_model // h
    scale = 1.0 / math.sqrt(d_k)
    params = {}
    bound = 1.0 / math.sqrt(d_model)
    for name in ("wq", "wk", "wv", "wo"):
        key, k1, k2 = jax.random.split(key, 3)
        params[name] = jax.random.uniform(
            k1, (d_model, d_model), dtype=dtype, minval=-bound, maxval=bound)
        params[name + "_b"] = jax.random.uniform(
            k2, (d_model,), dtype=dtype, minval=-bound, maxval=bound)
    params["wq_s"] = params["wq"] * scale
    params["wq_b_s"] = params["wq_b"] * scale
    params["w_kv"] = jnp.concatenate([params["wk"], params["wv"]], axis=1)
    params["b_kv"] = jnp.concatenate([params["wk_b"], params["wv_b"]], axis=0)
    params["w_qkv"] = jnp.concatenate(
        [params["wk"], params["wv"], params["wq_s"]], axis=1)          # (D,3D)
    params["b_qkv"] = jnp.concatenate(
        [params["wk_b"], params["wv_b"], params["wq_b_s"]], axis=0)    # (3D,)
    return params


def multi_headed_attention(params, query, key, value, h,
                           attn_dtype=jnp.bfloat16):
    """query: (B, Sq, D), key/value: (B, Skv, D) -> (B, Sq, D).

    `attn_dtype` is the MXU operand dtype inside the attention kernel (the
    Q/K/V projections emit it); softmax stats and accumulation stay f32 and
    the attention output / final projection are in the input dtype.
    Note: the fused fast paths trigger on Python object identity
    (query is key is value), matching the usual self-attention call pattern;
    equal-but-distinct arrays take the separate-projection path.
    """
    B, Sq, D = query.shape
    Skv = key.shape[1]
    d_k = D // h
    out_dtype = query.dtype
    lane_ok = (D % 128 == 0)   # fused column-slab paths need 128-aligned D

    if (query is key) and (key is value) and lane_ok:
        # One fused QKV projection: activation read from HBM once; attention
        # pulls Q (col block 2) and the [K|V] slab (col block 0) directly
        # out of the (B, S, 3D) projection output.
        qkv = linear(query.reshape(B * Sq, D), params["w_qkv"],
                     params["b_qkv"], out_dtype=attn_dtype)
        qkv = qkv.reshape(B, Sq, 3 * D)          # free reshape, no transpose
        x = _mha_attention(qkv, (qkv,), h=h, d_k=d_k,
                           out_dtype=out_dtype, q_colblk=2)
    elif (key is value) and lane_ok:
        q = linear(query.reshape(B * Sq, D), params["wq_s"], params["wq_b_s"],
                   out_dtype=attn_dtype).reshape(B, Sq, D)
        kv = linear(key.reshape(B * Skv, D), params["w_kv"], params["b_kv"],
                    out_dtype=attn_dtype).reshape(B, Skv, 2 * D)
        x = _mha_attention(q, (kv,), h=h, d_k=d_k, out_dtype=out_dtype)
    else:
        q = linear(query.reshape(B * Sq, D), params["wq_s"], params["wq_b_s"],
                   out_dtype=attn_dtype).reshape(B, Sq, D)
        k = linear(key.reshape(B * Skv, D), params["wk"], params["wk_b"],
                   out_dtype=attn_dtype).reshape(B, Skv, D)
        v = linear(value.reshape(B * Skv, D), params["wv"], params["wv_b"],
                   out_dtype=attn_dtype).reshape(B, Skv, D)
        x = _mha_attention(q, (k, v), h=h, d_k=d_k, out_dtype=out_dtype)

    # x is already (B, Sq, h*d_k) lane-dense -> straight into output projection.
    out = linear(x.reshape(B * Sq, D), params["wo"], params["wo_b"])
    return out.reshape(B, Sq, D)


# ---------------------------------- driver -----------------------------------

if __name__ == "__main__":
    B, S, D, H = 2, 8, 128, 4      # batch, seq, d_model, heads (d_k = 32)

    root = jax.random.PRNGKey(0)
    kp, kq, kk, kv = jax.random.split(root, 4)

    params = init_multihead_params(kp, H, D)
    query = jax.random.normal(kq, (B, S, D), dtype=jnp.float32)
    key_in = jax.random.normal(kk, (B, S, D), dtype=jnp.float32)
    value = jax.random.normal(kv, (B, S, D), dtype=jnp.float32)

    # Cross-attention path (separate projections, 3-input attention kernel).
    out_cross = jax.block_until_ready(
        multi_headed_attention(params, query, key_in, value, H))
    # Self-attention path (fused QKV projection, fused [K|V] DMA).
    out_self = jax.block_until_ready(
        multi_headed_attention(params, query, query, query, H))

    # Pure-JAX f32 reference (exact softmax, unscaled wq with explicit /sqrt(d_k)).
    def reference(q, k, v):
        d_k = D // H

        def proj(x, w, b):
            y = x.reshape(-1, D) @ w + b
            return jnp.transpose(y.reshape(B, -1, H, d_k), (0, 2, 1, 3))

        qh, kh, vh = proj(q, params["wq"], params["wq_b"]), \
                     proj(k, params["wk"], params["wk_b"]), \
                     proj(v, params["wv"], params["wv_b"])
        s = jnp.einsum("bhqd,bhkd->bhqk", qh, kh) / math.sqrt(d_k)
        p = jax.nn.softmax(s, axis=-1)
        o = jnp.einsum("bhqk,bhkd->bhqd", p, vh)
        o = jnp.transpose(o, (0, 2, 1, 3)).reshape(-1, D)
        return (o @ params["wo"] + params["wo_b"]).reshape(B, -1, D)

    exp_cross = reference(query, key_in, value)
    exp_self = reference(query, query, query)

    # Tolerance accounts for bf16 MXU operands inside the attention kernel
    # (softmax stats, accumulation and the output projection remain f32).
    assert jnp.allclose(out_cross, exp_cross, atol=2e-2, rtol=2e-2), "cross-attn mismatch"
    assert jnp.allclose(out_self, exp_self, atol=2e-2, rtol=2e-2), "self-attn mismatch"

    print("KERNEL_OK")
</pallas_src>

<mosaic_0001>
module attributes {stable_mosaic.version = 11 : i64} {
  func.func @_linear_kernel(%arg0: i32, %arg1: i32, %arg2: i32, %arg3: memref<16x128xf32, #tpu.memory_space<vmem>>, %arg4: memref<128x128xf32, #tpu.memory_space<vmem>>, %arg5: memref<1x128xf32, #tpu.memory_space<vmem>>, %arg6: memref<16x128xbf16, #tpu.memory_space<vmem>>, %arg7: memref<16x128xf32, #tpu.memory_space<vmem>>) attributes {dimension_semantics = [#tpu.dimension_semantics<parallel>, #tpu.dimension_semantics<parallel>, #tpu.dimension_semantics<arbitrary>], iteration_bounds = array<i64: 1, 1, 1>, scalar_prefetch = 0 : i64, scratch_operands = 1 : i64, tpu.core_type = #tpu.core_type<tc>, window_params = [{transform_indices = @transform_0, window_bounds = array<i64: 16, 128>}, {transform_indices = @transform_1, window_bounds = array<i64: 128, 128>}, {transform_indices = @transform_2, window_bounds = array<i64: 1, 128>}, {transform_indices = @transform_3, window_bounds = array<i64: 16, 128>}]} {
    %c0_i32 = arith.constant 0 : i32
    %0 = arith.cmpi eq, %arg2, %c0_i32 : i32
    %1 = arith.extui %0 : i1 to i32
    %c0_i32_0 = arith.constant 0 : i32
    %2 = arith.cmpi ne, %1, %c0_i32_0 : i32
    scf.if %2 {
      %cst_10 = arith.constant 0.000000e+00 : f32
      %12 = vector.broadcast %cst_10 : f32 to vector<16x128xf32>
      %c0_11 = arith.constant 0 : index
      %c0_12 = arith.constant 0 : index
      %13 = vector.load %arg7[%c0_11, %c0_12] : memref<16x128xf32, #tpu.memory_space<vmem>>, vector<16x128xf32>
      tpu.vector_store %arg7[%c0_11, %c0_12], %12 {strides = array<i32>} : memref<16x128xf32, #tpu.memory_space<vmem>>, vector<16x128xf32>,
    } else {
    }
    %c0 = arith.constant 0 : index
    %c0_1 = arith.constant 0 : index
    %3 = vector.load %arg7[%c0, %c0_1] : memref<16x128xf32, #tpu.memory_space<vmem>>, vector<16x128xf32>
    %c0_2 = arith.constant 0 : index
    %c0_3 = arith.constant 0 : index
    %4 = vector.load %arg3[%c0_2, %c0_3] : memref<16x128xf32, #tpu.memory_space<vmem>>, vector<16x128xf32>
    %c0_4 = arith.constant 0 : index
    %c0_5 = arith.constant 0 : index
    %5 = vector.load %arg4[%c0_4, %c0_5] : memref<128x128xf32, #tpu.memory_space<vmem>>, vector<128x128xf32>
    %cst = arith.constant dense<0.000000e+00> : vector<16x128xf32>
    %6 = tpu.matmul %4, %5, %cst {dimension_numbers = #tpu.dot_dimension_numbers<[1], [0], [0], [1], [0, 0, 1, 1], [], []>} : vector<16x128xf32>, vector<128x128xf32>, vector<16x128xf32> -> vector<16x128xf32>
    %7 = arith.addf %3, %6 : vector<16x128xf32>
    %c0_6 = arith.constant 0 : index
    %c0_7 = arith.constant 0 : index
    %8 = vector.load %arg7[%c0_6, %c0_7] : memref<16x128xf32, #tpu.memory_space<vmem>>, vector<16x128xf32>
    tpu.vector_store %arg7[%c0_6, %c0_7], %7 {strides = array<i32>} : memref<16x128xf32, #tpu.memory_space<vmem>>, vector<16x128xf32>,
    %c0_i32_8 = arith.constant 0 : i32
    %9 = arith.cmpi eq, %arg2, %c0_i32_8 : i32
    %10 = arith.extui %9 : i1 to i32
    %c0_i32_9 = arith.constant 0 : i32
    %11 = arith.cmpi ne, %10, %c0_i32_9 : i32
    scf.if %11 {
      %c0_10 = arith.constant 0 : index
      %c0_11 = arith.constant 0 : index
      %12 = vector.load %arg7[%c0_10, %c0_11] : memref<16x128xf32, #tpu.memory_space<vmem>>, vector<16x128xf32>
      %c0_12 = arith.constant 0 : index
      %c0_13 = arith.constant 0 : index
      %13 = vector.load %arg5[%c0_12, %c0_13] : memref<1x128xf32, #tpu.memory_space<vmem>>, vector<1x128xf32>
      %14 = vector.broadcast %13 : vector<1x128xf32> to vector<16x128xf32>
      %15 = arith.addf %12, %14 : vector<16x128xf32>
      %16 = arith.truncf %15 : vector<16x128xf32> to vector<16x128xbf16>
      %c0_14 = arith.constant 0 : index
      %c0_15 = arith.constant 0 : index
      %17 = vector.load %arg6[%c0_14, %c0_15] : memref<16x128xbf16, #tpu.memory_space<vmem>>, vector<16x128xbf16>
      tpu.vector_store %arg6[%c0_14, %c0_15], %16 {strides = array<i32>} : memref<16x128xbf16, #tpu.memory_space<vmem>>, vector<16x128xbf16>,
    } else {
    }
    return
  }
  func.func @transform_0(%arg0: i32, %arg1: i32, %arg2: i32) -> (i32, i32) {
    %c0_i32 = arith.constant 0 : i32
    return %arg0, %arg2 : i32, i32
  }
  func.func @transform_1(%arg0: i32, %arg1: i32, %arg2: i32) -> (i32, i32) {
    %c0_i32 = arith.constant 0 : i32
    return %arg2, %arg1 : i32, i32
  }
  func.func @transform_2(%arg0: i32, %arg1: i32, %arg2: i32) -> (i32, i32) {
    %c0_i32 = arith.constant 0 : i32
    %c0_i32_0 = arith.constant 0 : i32
    return %c0_i32, %arg1 : i32, i32
  }
  func.func @transform_3(%arg0: i32, %arg1: i32, %arg2: i32) -> (i32, i32) {
    %c0_i32 = arith.constant 0 : i32
    return %arg0, %arg1 : i32, i32
  }
}

</mosaic_0001>

<bundles_post_ra>
// kernel: tpu_custom_call.1
= control target key start
LH: loop header
LB: loop body
LE: loop exit
PB: predicated region body
PF: predicated region fallthrough
CT: control target
= control target key end

     0   :  { %8 = vsyncpa [#allocation4], 0  ;;  %s430_s0 = inlined_call_operand.hbm [shape: f32[16,128], index: 0, kind: input, shape index: {}]   ;;  %s431_s1 = inlined_call_operand.hbm [shape: f32[128,128], index: 1, kind: input, shape index: {}]   ;;  %s432_s2 = inlined_call_operand.vmem [shape: f32[1,128], index: 2, kind: input, shape index: {}]   ;;  %s433_s3 = inlined_call_operand.hbm [shape: bf16[16,128], index: 3, kind: output, shape index: {}]  }
   0x1   :  { %9 = vsyncpa [#allocation7], 0 }
   0x2   :  { %10 = vsyncpa [#allocation5], 0  ;;  %s364_s12 = smov [#allocation3]   ;;  %s292_s16 = scalar_lea.hbm %s430_s0, 256 }
   0x3   :  { %s16_s13 = sshll.u32 %s364_s12, 4  ;;  %p293_p0 = scmp.ne.s32.totalorder %s430_s0, %s292_s16  ;;  %s17_s13 = int_to_ptr.vmem [resolvable:$true] %s16_s13 }
   0x4   :  { %p296_p1 = scmp.lt.u32.totalorder %s292_s16, %s430_s0 }
   0x6   :  { %p298_p2 = pnand %p296_p1, %p293_p0 }
   0x8   :  { %301 = shalt.err (!%p298_p2)
}
   0x9   :  { %s302_s21 = scalar_lea.vmem %s17_s13, 256  ;;  %p307_p4 = scmp.lt.s32.totalorder %s17_s13, %s17_s13 }
   0xa   :  { %p303_p3 = scmp.ne.s32.totalorder %s17_s13, %s302_s21  ;;  %p308_p5 = scmp.lt.s32.totalorder %s302_s21, %s302_s21 }
   0xc   :  { %p309_p6 = por %p308_p5, %p307_p4 }
   0xe   :  { %p310_p7 = pnand %p309_p6, %p303_p3 }
  0x10   :  { %313 = shalt.err (!%p310_p7)
}
  0x11   :  { %s365_s22 = smov 128   ;;  %s366_s23 = smov 8  }
  0x12   :  { %22 = dma.hbm_to_vmem [thread:$0]  %s430_s0, 256, %s17_s13, [#allocation4], %s365_s22, %s365_s22, %s366_s23  }
  0x13   :  { %s367_s26 = smov [#allocation6]   ;;  %s314_s30 = scalar_lea.hbm %s431_s1, 2048 }
  0x14   :  { %s28_s27 = sshll.u32 %s367_s26, 4  ;;  %p315_p8 = scmp.ne.s32.totalorder %s431_s1, %s314_s30  ;;  %s29_s27 = int_to_ptr.vmem [resolvable:$true] %s28_s27 }
  0x15   :  { %p318_p9 = scmp.lt.u32.totalorder %s314_s30, %s431_s1 }
  0x17   :  { %p320_p10 = pnand %p318_p9, %p315_p8 }
  0x19   :  { %323 = shalt.err (!%p320_p10)
}
  0x1a   :  { %s324_s8 = scalar_lea.vmem %s29_s27, 2048  ;;  %p329_p12 = scmp.lt.s32.totalorder %s29_s27, %s29_s27 }
  0x1b   :  { %p325_p11 = scmp.ne.s32.totalorder %s29_s27, %s324_s8  ;;  %p330_p13 = scmp.lt.s32.totalorder %s324_s8, %s324_s8 }
  0x1d   :  { %p331_p0 = por %p330_p13, %p329_p12 }
  0x1f   :  { %p332_p1 = pnand %p331_p0, %p325_p11 }
  0x21   :  { %335 = shalt.err (!%p332_p1)
}
  0x22   :  { %34 = dma.hbm_to_vmem [thread:$0]  %s431_s1, 2048, %s29_s27, [#allocation7], %s365_s22, %s365_s22, %s366_s23  }
  0x23   :  { %358 = dma.done.wait [#allocation4], 256  }
  0x24   :  { %359 = vsyncadd [#allocation4], 4294967040 }
  0x25   :  { %360 = dma.done.wait [#allocation7], 2048  }
  0x26   :  { %361 = vsyncadd [#allocation7], 4294965248  ;;  %v53_v0 = vld [vmem:[#allocation6] sm:$0xff]  ;;  %v54_v1 = vld [vmem:[#allocation6 + $0x8] sm:$0xff]  ;;  %s368_s11 = smov [#allocation8]  }
  0x27   :  { %v55_v2 = vld [vmem:[#allocation6 + $0x10] sm:$0xff]  ;;  %v253_v3 = vpack.c.bf16 %v54_v1, %v53_v0  ;;  %v56_v4 = vld [vmem:[#allocation6 + $0x18] sm:$0xff]  ;;  %v57_v6 = vld [vmem:[#allocation6 + $0x20] sm:$0xff]  ;;  %s177_s12 = sshll.u32 %s368_s11, 4  ;;  %s178_s12 = int_to_ptr.vmem [resolvable:$true] %s177_s12 }
  0x28   :  { %v257_v5 = vpack.c.bf16 %v56_v4, %v55_v2  ;;  %v58_v7 = vld [vmem:[#allocation6 + $0x28] sm:$0xff]  ;;  %v51_v9 = vld [vmem:[#allocation3] sm:$0xff]  ;;  %v60_v11 = vld [vmem:[#allocation6 + $0x38] sm:$0xff]  ;;  %s336_s13 = scalar_lea.vmem %s178_s12, 128  ;;  %p341_p3 = scmp.lt.s32.totalorder %s178_s12, %s178_s12 }
  0x29   :  { %254 = vmatprep.subr.bf16.mxu0 %v253_v3  ;;  %v261_v8 = vpack.c.bf16 %v58_v7, %v57_v6  ;;  %v59_v10 = vld [vmem:[#allocation6 + $0x30] sm:$0xff]  ;;  %250 = vmatprep.mubr.f32.mxu0 %v51_v9  ;;  %v61_v13 = vld [vmem:[#allocation6 + $0x40] sm:$0xff]  ;;  %v62_v14 = vld [vmem:[#allocation6 + $0x48] sm:$0xff]  ;;  %p337_p2 = scmp.ne.s32.totalorder %s178_s12, %s336_s13  ;;  %p342_p4 = scmp.lt.s32.totalorder %s336_s13, %s336_s13 }
  0x2a   :  { %256 = vmatpush3.bf16.msra.mxu0 %v253_v3  ;;  %v265_v12 = vpack.c.bf16 %v60_v11, %v59_v10  ;;  %v269_v15 = vpack.c.bf16 %v62_v14, %v61_v13  ;;  %v63_v16 = vld [vmem:[#allocation6 + $0x50] sm:$0xff]  ;;  %v64_v17 = vld [vmem:[#allocation6 + $0x58] sm:$0xff]  ;;  %v65_v19 = vld [vmem:[#allocation6 + $0x60] sm:$0xff] }
  0x2b   :  { %258 = vmatprep.subr.bf16.mxu0 %v257_v5  ;;  %v273_v18 = vpack.c.bf16 %v64_v17, %v63_v16  ;;  %v66_v20 = vld [vmem:[#allocation6 + $0x68] sm:$0xff]  ;;  %v67_v22 = vld [vmem:[#allocation6 + $0x70] sm:$0xff]  ;;  %v68_v23 = vld [vmem:[#allocation6 + $0x78] sm:$0xff]  ;;  %p343_p5 = por %p342_p4, %p341_p3 }
  0x2c   :  { %v277_v21 = vpack.c.bf16 %v66_v20, %v65_v19  ;;  %v281_v24 = vpack.c.bf16 %v68_v23, %v67_v22  ;;  %v52_v25 = vld [vmem:[#allocation3 + $0x8] sm:$0xff]  ;;  %v190_v26 = vld [vmem:[%s432_s2] ss:$0 sm:$0xff] }
  0x2d   :  { %p344_p6 = pnand %p343_p5, %p337_p2 }
  0x2e   :  { %260 = vmatpush3.bf16.msra.mxu0 %v257_v5 }
  0x2f   :  { %262 = vmatprep.subr.bf16.mxu0 %v261_v8 }
  0x32   :  { %264 = vmatpush3.bf16.msra.mxu0 %v261_v8 }
  0x33   :  { %266 = vmatprep.subr.bf16.mxu0 %v265_v12 }
  0x36   :  { %268 = vmatpush3.bf16.msra.mxu0 %v265_v12 }
  0x37   :  { %270 = vmatprep.subr.bf16.mxu0 %v269_v15 }
  0x3a   :  { %272 = vmatpush3.bf16.msra.mxu0 %v269_v15 }
  0x3b   :  { %274 = vmatprep.subr.bf16.mxu0 %v273_v18 }
  0x3e   :  { %276 = vmatpush3.bf16.msra.mxu0 %v273_v18 }
  0x3f   :  { %278 = vmatprep.subr.bf16.mxu0 %v277_v21 }
  0x42   :  { %280 = vmatpush3.bf16.msra.mxu0 %v277_v21 }
  0x43   :  { %282 = vmatprep.subr.bf16.mxu0 %v281_v24 }
  0x46   :  { %284 = vmatpush3.bf16.msra.mxu0 %v281_v24 }
  0x49   :  { %251 = vmatmul.mubr.f32.vlgmr.msra.gmra.mrb[0].mxu0 %v52_v25 }
 0x11c   :  { %v252_v27 = vpop.f32.mrb[0].mxu0 }
 0x11d   :  { %v161_v28 = vadd.f32 %v252_v27, %v190_v26  ;;  %v135_v29 = vpop.f32.mrb[1].mxu0 }
 0x11e   :  { %v160_v30 = vadd.f32 %v190_v26, %v135_v29 }
 0x120   :  { %v198_v31 = vpack.c.bf16 %v161_v28, %v160_v30 }
 0x122   :  { %199 = vst [vmem:[#allocation8] sm:$0xff] %v198_v31  }
 0x123   :  { %347 = shalt.err (!%p344_p6)
}
 0x124   :  { %s348_s2 = scalar_lea.hbm %s433_s3, 128 }
 0x125   :  { %p349_p7 = scmp.ne.s32.totalorder %s433_s3, %s348_s2  ;;  %p352_p8 = scmp.lt.u32.totalorder %s348_s2, %s433_s3 }
 0x127   :  { %p354_p9 = pnand %p352_p8, %p349_p7 }
 0x129   :  { %357 = shalt.err (!%p354_p9)
}
 0x12a   :  { %s369_s20 = smov 64   ;;  %s370_s21 = smov 4  }
 0x12b   :  { %183 = dma.vmem_to_hbm [thread:$0]  %s178_s12, 128, %s433_s3, [#allocation5], %s369_s20, %s369_s20, %s370_s21  }
 0x12c   :  { %362 = dma.done.wait [#allocation5], 128  }
 0x12d   :  { %363 = vsyncadd [#allocation5], 4294967168 }
 0x12e   :  { %187 = vsyncpa [#allocation4], 1 }
 0x12f   :  { %188 = vsyncpa [#allocation7], 1 }
 0x130   :  { %189 = vsyncpa [#allocation5], 1 }

</bundles_post_ra>
